<compile_context>
chip_gen: v5e
topology: v5e:2x2
jax: 0.10.0
libtpu: 0.0.40
codegen_flags: <defaults>
</compile_context>

<pallas_src>
import math

import jax
import jax.numpy as jnp
from jax.experimental import pallas as pl
from jax.experimental.pallas import tpu as pltpu

_SQRT_2_OVER_PI = math.sqrt(2.0 / math.pi)


def _round_up(n, m):
    return ((n + m - 1) // m) * m


def _gelu_tanh_f32(x):
    # tanh-approximate GELU: transcendental goes to the EUP slot instead of a
    # ~25-op erf VALU chain; differs from exact erf GELU at the ~1e-3 level,
    # which is below the bf16 cast noise already present in the MXU path.
    return 0.5 * x * (1.0 + jnp.tanh(_SQRT_2_OVER_PI * (x + 0.044715 * x * x * x)))


def mlp_kernel(x_ref, w1_ref, b1_ref, w2_ref, b2_ref, w3_ref, b3_ref, o_ref):
    # x tile arrives as raw f32 from HBM; cast to bf16 in VMEM for the MXU.
    # All three layers stay fused per batch tile (activations never leave VMEM).
    xb = x_ref[...].astype(jnp.bfloat16)                       # (TB, 90)
    h1 = jnp.dot(xb, w1_ref[...],
                 preferred_element_type=jnp.float32)           # (TB, 128) f32
    h1 = _gelu_tanh_f32(h1 + b1_ref[...])

    h2 = jnp.dot(h1.astype(jnp.bfloat16), w2_ref[...],
                 preferred_element_type=jnp.float32)           # (TB, 64) f32
    h2 = _gelu_tanh_f32(h2 + b2_ref[...])

    out = jnp.dot(h2.astype(jnp.bfloat16), w3_ref[...],
                  preferred_element_type=jnp.float32)          # (TB, 10) f32
    o_ref[...] = (out + b3_ref[...]).astype(o_ref.dtype)


def _choose_tb(batch, block_b):
    """Batch-tile size: big (amortize per-step overhead), 16-row multiple for
    bf16 sublane packing, and an even grid length when multi-tile so the
    'parallel' batch axis splits evenly across v7x's 2 TensorCores."""
    if batch <= block_b:
        return _round_up(batch, 8)            # single (possibly partial) tile
    n_tiles = -(-batch // block_b)
    if n_tiles % 2:
        n_tiles += 1                          # even grid for 2-TC chips
    return _round_up(-(-batch // n_tiles), 16)


def model_i_forward(x, params, *, block_b=2048):
    """x: (B, 90) f32; params: (w1,b1,w2,b2,w3,b3) with w stored as [in, out]."""
    w1, b1, w2, b2, w3, b3 = params
    B, in_dim = x.shape
    out_dim = w3.shape[1]

    tb = _choose_tb(B, block_b)
    grid = (-(-B // tb),)   # cdiv; last block may be partial (writes masked)

    # Only tiny one-time host prep: bf16 MXU weights, f32 biases.
    # x itself is NOT copied/padded/cast on the host (it is HBM-bound traffic).
    w1_b = w1.astype(jnp.bfloat16)
    w2_b = w2.astype(jnp.bfloat16)
    w3_b = w3.astype(jnp.bfloat16)
    b1_f = b1.astype(jnp.float32)
    b2_f = b2.astype(jnp.float32)
    b3_f = b3.astype(jnp.float32)

    in_specs = [
        pl.BlockSpec((tb, in_dim), lambda i: (i, 0)),     # x: batch-tiled
        pl.BlockSpec(w1_b.shape, lambda i: (0, 0)),       # weights/biases:
        pl.BlockSpec(b1_f.shape, lambda i: (0, 0)),       # constant block,
        pl.BlockSpec(w2_b.shape, lambda i: (0, 0)),       # stay VMEM-resident
        pl.BlockSpec(b2_f.shape, lambda i: (0, 0)),
        pl.BlockSpec(w3_b.shape, lambda i: (0, 0)),
        pl.BlockSpec(b3_f.shape, lambda i: (0, 0)),
    ]
    out_specs = pl.BlockSpec((tb, out_dim), lambda i: (i, 0))

    return pl.pallas_call(
        mlp_kernel,
        out_shape=jax.ShapeDtypeStruct((B, out_dim), jnp.float32),
        grid=grid,
        in_specs=in_specs,
        out_specs=out_specs,
        compiler_params=pltpu.CompilerParams(
            dimension_semantics=("parallel",),
            vmem_limit_bytes=32 * 1024 * 1024),
    )(x, w1_b, b1_f, w2_b, b2_f, w3_b, b3_f)


def init_params(key, input_dim=90, hidden1=128, hidden2=64, output_dim=10,
                dtype=jnp.float32):
    """Deterministic init mimicking nn.Linear's default (Kaiming-uniform)."""
    def linear_init(k, fan_in, fan_out):
        k_w, k_b = jax.random.split(k)
        bound = 1.0 / math.sqrt(fan_in)
        # stored as [in, out] (transpose of PyTorch's [out, in])
        w = jax.random.uniform(k_w, (fan_in, fan_out), dtype, -bound, bound)
        b = jax.random.uniform(k_b, (1, fan_out), dtype, -bound, bound)
        return w, b

    k1, k2, k3 = jax.random.split(key, 3)
    w1, b1 = linear_init(k1, input_dim, hidden1)
    w2, b2 = linear_init(k2, hidden1, hidden2)
    w3, b3 = linear_init(k3, hidden2, output_dim)
    return (w1, b1, w2, b2, w3, b3)


def reference_forward(x, params):
    # Matches PyTorch ModelI semantics (exact erf GELU, f32).
    w1, b1, w2, b2, w3, b3 = params
    h1 = jax.nn.gelu(x @ w1 + b1, approximate=False)
    h2 = jax.nn.gelu(h1 @ w2 + b2, approximate=False)
    return h2 @ w3 + b3


if __name__ == "__main__":
    key = jax.random.PRNGKey(0)
    k_params, k_x1, k_x2 = jax.random.split(key, 3)

    input_dim, output_dim = 90, 10
    params = init_params(k_params, input_dim=input_dim, output_dim=output_dim)
    fwd = jax.jit(model_i_forward, static_argnames=("block_b",))

    # Small-batch check (single tile, TB = 8).
    B_small = 8
    x_small = jax.random.normal(k_x1, (B_small, input_dim), jnp.float32)
    out_small = jax.block_until_ready(fwd(x_small, params))
    ref_small = reference_forward(x_small, params)
    assert out_small.shape == (B_small, output_dim)
    assert jnp.allclose(out_small, ref_small, atol=5e-2, rtol=5e-2), \
        "small-batch mismatch vs reference"

    # Non-multiple batch with a small block_b to exercise the cdiv grid,
    # even-grid tile choice, and masked partial-last-block writeback.
    B_big = 300
    x_big = jax.random.normal(k_x2, (B_big, input_dim), jnp.float32)
    out_big = jax.block_until_ready(fwd(x_big, params, block_b=128))
    ref_big = reference_forward(x_big, params)
    assert out_big.shape == (B_big, output_dim)
    assert jnp.allclose(out_big, ref_big, atol=5e-2, rtol=5e-2), \
        "large-batch mismatch vs reference"

    print("KERNEL_OK")
</pallas_src>

<mosaic_0001>
module attributes {stable_mosaic.version = 11 : i64} {
  func.func @mlp_kernel(%arg0: i32, %arg1: memref<8x90xf32, #tpu.memory_space<vmem>>, %arg2: memref<90x128xbf16, #tpu.memory_space<vmem>>, %arg3: memref<1x128xf32, #tpu.memory_space<vmem>>, %arg4: memref<128x64xbf16, #tpu.memory_space<vmem>>, %arg5: memref<1x64xf32, #tpu.memory_space<vmem>>, %arg6: memref<64x10xbf16, #tpu.memory_space<vmem>>, %arg7: memref<1x10xf32, #tpu.memory_space<vmem>>, %arg8: memref<8x10xf32, #tpu.memory_space<vmem>>) attributes {dimension_semantics = [#tpu.dimension_semantics<parallel>], iteration_bounds = array<i64: 1>, scalar_prefetch = 0 : i64, scratch_operands = 0 : i64, tpu.core_type = #tpu.core_type<tc>, window_params = [{transform_indices = @transform_0, window_bounds = array<i64: 8, 90>}, {pipeline_mode = #tpu.pipeline_mode<synchronous>, transform_indices = @transform_1, window_bounds = array<i64: 90, 128>}, {pipeline_mode = #tpu.pipeline_mode<synchronous>, transform_indices = @transform_2, window_bounds = array<i64: 1, 128>}, {pipeline_mode = #tpu.pipeline_mode<synchronous>, transform_indices = @transform_3, window_bounds = array<i64: 128, 64>}, {pipeline_mode = #tpu.pipeline_mode<synchronous>, transform_indices = @transform_4, window_bounds = array<i64: 1, 64>}, {pipeline_mode = #tpu.pipeline_mode<synchronous>, transform_indices = @transform_5, window_bounds = array<i64: 64, 10>}, {pipeline_mode = #tpu.pipeline_mode<synchronous>, transform_indices = @transform_6, window_bounds = array<i64: 1, 10>}, {transform_indices = @transform_7, window_bounds = array<i64: 8, 10>}]} {
    %c0 = arith.constant 0 : index
    %c0_0 = arith.constant 0 : index
    %0 = vector.load %arg1[%c0, %c0_0] : memref<8x90xf32, #tpu.memory_space<vmem>>, vector<8x90xf32>
    %1 = arith.truncf %0 : vector<8x90xf32> to vector<8x90xbf16>
    %c0_1 = arith.constant 0 : index
    %c0_2 = arith.constant 0 : index
    %2 = vector.load %arg2[%c0_1, %c0_2] : memref<90x128xbf16, #tpu.memory_space<vmem>>, vector<90x128xbf16>
    %cst = arith.constant dense<0.000000e+00> : vector<8x128xf32>
    %3 = tpu.matmul %1, %2, %cst {dimension_numbers = #tpu.dot_dimension_numbers<[1], [0], [0], [1], [0, 0, 1, 1], [], []>} : vector<8x90xbf16>, vector<90x128xbf16>, vector<8x128xf32> -> vector<8x128xf32>
    %c0_3 = arith.constant 0 : index
    %c0_4 = arith.constant 0 : index
    %4 = vector.load %arg3[%c0_3, %c0_4] : memref<1x128xf32, #tpu.memory_space<vmem>>, vector<1x128xf32>
    %5 = vector.broadcast %4 : vector<1x128xf32> to vector<8x128xf32>
    %6 = arith.addf %3, %5 : vector<8x128xf32>
    %cst_5 = arith.constant 5.000000e-01 : f32
    %7 = vector.broadcast %cst_5 : f32 to vector<8x128xf32>
    %8 = arith.mulf %7, %6 : vector<8x128xf32>
    %cst_6 = arith.constant 4.471500e-02 : f32
    %9 = vector.broadcast %cst_6 : f32 to vector<8x128xf32>
    %10 = arith.mulf %9, %6 : vector<8x128xf32>
    %11 = arith.mulf %10, %6 : vector<8x128xf32>
    %12 = arith.mulf %11, %6 : vector<8x128xf32>
    %13 = arith.addf %6, %12 : vector<8x128xf32>
    %cst_7 = arith.constant 0.797884583 : f32
    %14 = vector.broadcast %cst_7 : f32 to vector<8x128xf32>
    %15 = arith.mulf %14, %13 : vector<8x128xf32>
    %16 = math.tanh %15 : vector<8x128xf32>
    %cst_8 = arith.constant 1.000000e+00 : f32
    %17 = vector.broadcast %cst_8 : f32 to vector<8x128xf32>
    %18 = arith.addf %17, %16 : vector<8x128xf32>
    %19 = arith.mulf %8, %18 : vector<8x128xf32>
    %20 = arith.truncf %19 : vector<8x128xf32> to vector<8x128xbf16>
    %c0_9 = arith.constant 0 : index
    %c0_10 = arith.constant 0 : index
    %21 = vector.load %arg4[%c0_9, %c0_10] : memref<128x64xbf16, #tpu.memory_space<vmem>>, vector<128x64xbf16>
    %cst_11 = arith.constant dense<0.000000e+00> : vector<8x64xf32>
    %22 = tpu.matmul %20, %21, %cst_11 {dimension_numbers = #tpu.dot_dimension_numbers<[1], [0], [0], [1], [0, 0, 1, 1], [], []>} : vector<8x128xbf16>, vector<128x64xbf16>, vector<8x64xf32> -> vector<8x64xf32>
    %c0_12 = arith.constant 0 : index
    %c0_13 = arith.constant 0 : index
    %23 = vector.load %arg5[%c0_12, %c0_13] : memref<1x64xf32, #tpu.memory_space<vmem>>, vector<1x64xf32>
    %24 = vector.broadcast %23 : vector<1x64xf32> to vector<8x64xf32>
    %25 = arith.addf %22, %24 : vector<8x64xf32>
    %cst_14 = arith.constant 5.000000e-01 : f32
    %26 = vector.broadcast %cst_14 : f32 to vector<8x64xf32>
    %27 = arith.mulf %26, %25 : vector<8x64xf32>
    %cst_15 = arith.constant 4.471500e-02 : f32
    %28 = vector.broadcast %cst_15 : f32 to vector<8x64xf32>
    %29 = arith.mulf %28, %25 : vector<8x64xf32>
    %30 = arith.mulf %29, %25 : vector<8x64xf32>
    %31 = arith.mulf %30, %25 : vector<8x64xf32>
    %32 = arith.addf %25, %31 : vector<8x64xf32>
    %cst_16 = arith.constant 0.797884583 : f32
    %33 = vector.broadcast %cst_16 : f32 to vector<8x64xf32>
    %34 = arith.mulf %33, %32 : vector<8x64xf32>
    %35 = math.tanh %34 : vector<8x64xf32>
    %cst_17 = arith.constant 1.000000e+00 : f32
    %36 = vector.broadcast %cst_17 : f32 to vector<8x64xf32>
    %37 = arith.addf %36, %35 : vector<8x64xf32>
    %38 = arith.mulf %27, %37 : vector<8x64xf32>
    %39 = arith.truncf %38 : vector<8x64xf32> to vector<8x64xbf16>
    %c0_18 = arith.constant 0 : index
    %c0_19 = arith.constant 0 : index
    %40 = vector.load %arg6[%c0_18, %c0_19] : memref<64x10xbf16, #tpu.memory_space<vmem>>, vector<64x10xbf16>
    %cst_20 = arith.constant dense<0.000000e+00> : vector<8x10xf32>
    %41 = tpu.matmul %39, %40, %cst_20 {dimension_numbers = #tpu.dot_dimension_numbers<[1], [0], [0], [1], [0, 0, 1, 1], [], []>} : vector<8x64xbf16>, vector<64x10xbf16>, vector<8x10xf32> -> vector<8x10xf32>
    %c0_21 = arith.constant 0 : index
    %c0_22 = arith.constant 0 : index
    %42 = vector.load %arg7[%c0_21, %c0_22] : memref<1x10xf32, #tpu.memory_space<vmem>>, vector<1x10xf32>
    %43 = vector.broadcast %42 : vector<1x10xf32> to vector<8x10xf32>
    %44 = arith.addf %41, %43 : vector<8x10xf32>
    %c0_23 = arith.constant 0 : index
    %c0_24 = arith.constant 0 : index
    %45 = vector.load %arg8[%c0_23, %c0_24] : memref<8x10xf32, #tpu.memory_space<vmem>>, vector<8x10xf32>
    tpu.vector_store %arg8[%c0_23, %c0_24], %44 {strides = array<i32>} : memref<8x10xf32, #tpu.memory_space<vmem>>, vector<8x10xf32>,
    return
  }
  func.func @transform_0(%arg0: i32) -> (i32, i32) {
    %c0_i32 = arith.constant 0 : i32
    %c0_i32_0 = arith.constant 0 : i32
    return %arg0, %c0_i32 : i32, i32
  }
  func.func @transform_1(%arg0: i32) -> (i32, i32) {
    %c0_i32 = arith.constant 0 : i32
    %c0_i32_0 = arith.constant 0 : i32
    %c0_i32_1 = arith.constant 0 : i32
    return %c0_i32, %c0_i32_0 : i32, i32
  }
  func.func @transform_2(%arg0: i32) -> (i32, i32) {
    %c0_i32 = arith.constant 0 : i32
    %c0_i32_0 = arith.constant 0 : i32
    %c0_i32_1 = arith.constant 0 : i32
    return %c0_i32, %c0_i32_0 : i32, i32
  }
  func.func @transform_3(%arg0: i32) -> (i32, i32) {
    %c0_i32 = arith.constant 0 : i32
    %c0_i32_0 = arith.constant 0 : i32
    %c0_i32_1 = arith.constant 0 : i32
    return %c0_i32, %c0_i32_0 : i32, i32
  }
  func.func @transform_4(%arg0: i32) -> (i32, i32) {
    %c0_i32 = arith.constant 0 : i32
    %c0_i32_0 = arith.constant 0 : i32
    %c0_i32_1 = arith.constant 0 : i32
    return %c0_i32, %c0_i32_0 : i32, i32
  }
  func.func @transform_5(%arg0: i32) -> (i32, i32) {
    %c0_i32 = arith.constant 0 : i32
    %c0_i32_0 = arith.constant 0 : i32
    %c0_i32_1 = arith.constant 0 : i32
    return %c0_i32, %c0_i32_0 : i32, i32
  }
  func.func @transform_6(%arg0: i32) -> (i32, i32) {
    %c0_i32 = arith.constant 0 : i32
    %c0_i32_0 = arith.constant 0 : i32
    %c0_i32_1 = arith.constant 0 : i32
    return %c0_i32, %c0_i32_0 : i32, i32
  }
  func.func @transform_7(%arg0: i32) -> (i32, i32) {
    %c0_i32 = arith.constant 0 : i32
    %c0_i32_0 = arith.constant 0 : i32
    return %arg0, %c0_i32 : i32, i32
  }
}

</mosaic_0001>

<bundles_post_ra>
// kernel: model_i_forward.1
= control target key start
LH: loop header
LB: loop body
LE: loop exit
PB: predicated region body
PF: predicated region fallthrough
CT: control target
= control target key end

     0   :  { %vm85_vm0 = vcmask 1044480   ;;  %s513_s0 = inlined_call_operand.vmem [shape: f32[8,90], index: 0, kind: input, shape index: {}]   ;;  %s514_s1 = inlined_call_operand.vmem [shape: bf16[90,128], index: 1, kind: input, shape index: {}]   ;;  %s515_s2 = inlined_call_operand.vmem [shape: f32[1,128], index: 2, kind: input, shape index: {}]   ;;  %s516_s3 = inlined_call_operand.vmem [shape: bf16[128,64], index: 3, kind: input, shape index: {}]   ;;  %s517_s4 = inlined_call_operand.vmem [shape: f32[1,64], index: 4, kind: input, shape index: {}]   ;;  %s518_s5 = inlined_call_operand.vmem [shape: bf16[64,10], index: 5, kind: input, shape index: {}]   ;;  %s519_s6 = inlined_call_operand.vmem [shape: f32[1,10], index: 6, kind: input, shape index: {}]   ;;  %s520_s7 = inlined_call_operand.hbm [shape: f32[8,10], index: 7, kind: output, shape index: {}]  }
   0x1   :  { %v296_v0 = vld [vmem:[%s514_s1 + $0x28] sm:$0xf]  ;;  %v353_v1 = vld [vmem:[%s514_s1 + $0x28] sm:$0x10]  ;;  %v361_v3 = vld [vmem:[%s516_s3 + $0x38] sm:$0xff] }
   0x2   :  { %v297_v2 = vor.u32 %v353_v1, %v296_v0  ;;  %v352_v5 = vld [vmem:[%s514_s1 + $0x20] sm:$0xff]  ;;  %v360_v6 = vld [vmem:[%s516_s3 + $0x30] sm:$0xff]  ;;  %180 = vmatpush.bf16.msra.mxu1 %v361_v3 }
   0x4   :  { %v87_v4 = vsel %vm85_vm0, %v297_v2, 0 }
   0x5   :  { %91 = vmatpush.bf16.msra.mxu0 %v87_v4 }
   0x6   :  { %12 = vsyncpa [#allocation3], 0  ;;  %v351_v7 = vld [vmem:[%s514_s1 + $0x18] sm:$0xff]  ;;  %181 = vmatpush.bf16.msra.mxu1 %v360_v6  ;;  %v350_v8 = vld [vmem:[%s514_s1 + $0x10] sm:$0xff]  ;;  %vm81_vm1 = vcmask 736256   ;;  %vm239_vm2 = vcmask 523264  }
   0x7   :  { %v349_v9 = vld [vmem:[%s514_s1 + $0x8] sm:$0xff]  ;;  %v348_v10 = vld [vmem:[%s514_s1] sm:$0xff]  ;;  %v357_v15 = vld [vmem:[%s516_s3 + $0x18] sm:$0xff]  ;;  %s265_s22 = sshll.u32 %s520_s7, 4  ;;  %vm256_vm3 = vcmask 80896   ;;  %s266_s22 = int_to_ptr.hbm [resolvable:$true] %s265_s22 }
   0x8   :  { %v28_v11 = vld [vmem:[%s513_s0] sm:$0xff]  ;;  %v359_v13 = vld [vmem:[%s516_s3 + $0x28] sm:$0xff]  ;;  %v356_v16 = vld [vmem:[%s516_s3 + $0x10] sm:$0xff] }
   0x9   :  { %92 = vmatpush.bf16.msra.mxu0 %v352_v5  ;;  %v29_v12 = vpack.c.bf16 %v28_v11, %v28_v11  ;;  %v358_v14 = vld [vmem:[%s516_s3 + $0x20] sm:$0xff]  ;;  %v355_v17 = vld [vmem:[%s516_s3 + $0x8] sm:$0xff]  ;;  %v365_v33 = vld [vmem:[%s518_s5 + $0x18] sm:$0xff] }
   0xa   :  { %182 = vmatpush.bf16.msra.mxu1 %v359_v13  ;;  %v354_v18 = vld [vmem:[%s516_s3] sm:$0xff]  ;;  %247 = vmatpush.bf16.msra.mxu2 %v365_v33  ;;  %v364_v34 = vld [vmem:[%s518_s5 + $0x10] sm:$0xff]  ;;  %v363_v35 = vld [vmem:[%s518_s5 + $0x8] sm:$0xff] }
   0xb   :  { %v367_v19 = vld [vmem:[%s515_s2] ss:$0 sm:$0xff] }
   0xc   :  { %v362_v36 = vld [vmem:[%s518_s5] sm:$0xff] }
   0xd   :  { %93 = vmatpush.bf16.msra.mxu0 %v351_v7  ;;  %v368_v37 = vld [vmem:[%s517_s4] ss:$0 sm:$0xff]  ;;  %s400_s4 = smov [#allocation2]  }
   0xe   :  { %183 = vmatpush.bf16.msra.mxu1 %v358_v14  ;;  %248 = vmatpush.bf16.msra.mxu2 %v364_v34  ;;  %v369_v51 = vld [vmem:[%s519_s6] ss:$0 sm:$0xff]  ;;  %s263_s19 = sshll.u32 %s400_s4, 4  ;;  %s264_s19 = int_to_ptr.vmem [resolvable:$true] %s263_s19 }
  0x11   :  { %94 = vmatpush.bf16.msra.mxu0 %v350_v8 }
  0x12   :  { %184 = vmatpush.bf16.msra.mxu1 %v357_v15  ;;  %249 = vmatpush.bf16.msra.mxu2 %v363_v35 }
  0x15   :  { %95 = vmatpush.bf16.msra.mxu0 %v349_v9 }
  0x16   :  { %185 = vmatpush.bf16.msra.mxu1 %v356_v16  ;;  %250 = vmatpush.bf16.msra.mxu2 %v362_v36 }
  0x19   :  { %96 = vmatpush.bf16.msra.mxu0 %v348_v10 }
  0x1a   :  { %186 = vmatpush.bf16.msra.mxu1 %v355_v17 }
  0x1c   :  { %298 = vmatmul.msk.bf16.vlgmr.msra.gmra.mxu0 %vm81_vm1, %v29_v12 }
  0x1e   :  { %187 = vmatpush.bf16.msra.mxu1 %v354_v18 }
  0x99   :  { %v98_v20 = vpop.f32.mrf.mxu0 }
  0x9a   :  { %v99_v21 = vadd.f32 %v367_v19, %v98_v20 }
  0x9c   :  { %v103_v22 = vmul.f32 0.044715, %v99_v21  ;;  %v102_v29 = vmul.f32 0.5, %v99_v21 }
  0x9e   :  { %v104_v23 = vmul.f32 %v103_v22, %v99_v21 }
  0xa0   :  { %v105_v24 = vmul.f32 %v104_v23, %v99_v21 }
  0xa1   :  { %v100_v25 = vpop.f32.mrf.mxu0 }
  0xa2   :  { %v106_v26 = vadd.f32 %v105_v24, %v99_v21 }
  0xa4   :  { %v107_v27 = vmul.f32 0.7978846, %v106_v26 }
  0xa6   :  { %370 = vtanh.f32 %v107_v27 }
  0xac   :  { %v371_v28 = vpop.eup %370 }
  0xad   :  { %v109_v30 = vadd.f32 1.0, %v371_v28 }
  0xaf   :  { %v110_v31 = vmul.f32 %v109_v30, %v102_v29 }
  0xb1   :  { %v111_v32 = vpack.c.bf16 %v110_v31, %v110_v31 }
  0xb3   :  { %188 = vmatmul.bf16.vlgmr.msra.gmra.mxu1 %v111_v32 }
 0x130   :  { %v189_v38 = vpop.f32.mrf.mxu1 }
 0x131   :  { %v190_v39 = vadd.f32 %v368_v37, %v189_v38 }
 0x133   :  { %v194_v40 = vmul.f32 0.044715, %v190_v39  ;;  %v193_v47 = vmul.f32 0.5, %v190_v39 }
 0x135   :  { %v195_v41 = vmul.f32 %v194_v40, %v190_v39 }
 0x137   :  { %v196_v42 = vmul.f32 %v195_v41, %v190_v39 }
 0x138   :  { %v191_v43 = vpop.f32.mrf.mxu1 }
 0x139   :  { %v197_v44 = vadd.f32 %v196_v42, %v190_v39 }
 0x13b   :  { %v198_v45 = vmul.f32 0.7978846, %v197_v44 }
 0x13d   :  { %372 = vtanh.f32 %v198_v45 }
 0x143   :  { %v373_v46 = vpop.eup %372 }
 0x144   :  { %v200_v48 = vadd.f32 1.0, %v373_v46 }
 0x146   :  { %v201_v49 = vmul.f32 %v200_v48, %v193_v47 }
 0x148   :  { %v202_v50 = vpack.c.bf16 %v201_v49, %v201_v49 }
 0x14a   :  { %347 = vmatmul.msk.bf16.vlgmr.msra.gmra.mxu2 %vm239_vm2, %v202_v50 }
 0x1cd   :  { %v252_v52 = vpop.f32.mrf.mxu2 }
 0x1ce   :  { %v253_v53 = vadd.f32 %v369_v51, %v252_v52 }
 0x1d0   :  { %257 = vst.msk [vmem:[#allocation2] sm:$0xff] %vm256_vm3, %v253_v53 }
 0x1d1   :  { %268 = dma.vmem_to_hbm [thread:$0]  %s264_s19, 128, %s266_s22, [#allocation3]  }
 0x1d5   :  { %v254_v54 = vpop.f32.mrf.mxu2 }
 0x1d6   :  { %398 = dma.done.wait [#allocation3], 128  }
 0x1d7   :  { %399 = vsyncadd [#allocation3], 4294967168 }
 0x1d8   :  { %273 = vsyncpa [#allocation3], 1 }

</bundles_post_ra>
